<compile_context>
chip_gen: v5e
topology: v5e:2x2
jax: 0.10.0
libtpu: 0.0.40
codegen_flags: <defaults>
</compile_context>

<pallas_src>
import functools

import jax
import jax.numpy as jnp
from jax import lax
from jax.experimental import pallas as pl
from jax.experimental.pallas import tpu as pltpu


def _round_up(v, m):
    return (v + m - 1) // m * m


# ----------------------------- Pallas kernels ------------------------------

def _mm_relu_bn_kernel(x_ref, w_ref, b_ref, s_ref, t_ref, o_ref, acc_ref):
    # acc += x @ w (bf16 operands, f32 accumulate); finalize: BN(ReLU(acc + b)).
    @pl.when(pl.program_id(1) == 0)
    def _():
        acc_ref[...] = jnp.zeros_like(acc_ref)

    acc_ref[...] += jnp.dot(x_ref[...], w_ref[...],
                            preferred_element_type=jnp.float32)

    @pl.when(pl.program_id(1) == pl.num_programs(1) - 1)
    def _():
        y = jnp.maximum(acc_ref[...] + b_ref[...], 0.0)
        o_ref[...] = y * s_ref[...] + t_ref[...]


def _add_mm_relu_bn_kernel(a_ref, c_ref, w_ref, b_ref, s_ref, t_ref, o_ref,
                           acc_ref):
    # Fused union-feature add + Linear + ReLU + BN1d.
    @pl.when(pl.program_id(1) == 0)
    def _():
        acc_ref[...] = jnp.zeros_like(acc_ref)

    x = (a_ref[...].astype(jnp.float32)
         + c_ref[...].astype(jnp.float32)).astype(jnp.bfloat16)
    acc_ref[...] += jnp.dot(x, w_ref[...], preferred_element_type=jnp.float32)

    @pl.when(pl.program_id(1) == pl.num_programs(1) - 1)
    def _():
        y = jnp.maximum(acc_ref[...] + b_ref[...], 0.0)
        o_ref[...] = y * s_ref[...] + t_ref[...]


def _tiling(M, K, OC, block_m=512):
    Kp = _round_up(K, 128)
    OCp = _round_up(OC, 128)
    bm = min(block_m, _round_up(M, 16))     # bf16 sublane packing -> mult of 16
    Mp = _round_up(M, bm)
    bk = 128
    for cand in (512, 256, 128):
        if Kp % cand == 0:
            bk = cand
            break
    return Mp, Kp, OCp, bm, bk


def _pad_vec(v, OCp):
    return jnp.pad(v.astype(jnp.float32), (0, OCp - v.shape[0])).reshape(1, OCp)


def mm_relu_bn(x, w, b, scale, shift, *, slice_cols=True, block_m=512):
    """BN(ReLU(x @ w + b)) with BN folded into scale/shift. x:(M,K) w:(K,OC)."""
    M, K = x.shape
    OC = w.shape[1]
    Mp, Kp, OCp, bm, bk = _tiling(M, K, OC, block_m)

    xp = jnp.pad(x, ((0, Mp - M), (0, Kp - K))).astype(jnp.bfloat16)
    wp = jnp.pad(w, ((0, Kp - K), (0, OCp - OC))).astype(jnp.bfloat16)
    bp, sp, tp = _pad_vec(b, OCp), _pad_vec(scale, OCp), _pad_vec(shift, OCp)

    out = pl.pallas_call(
        _mm_relu_bn_kernel,
        out_shape=jax.ShapeDtypeStruct((Mp, OCp), jnp.float32),
        grid_spec=pltpu.PrefetchScalarGridSpec(
            num_scalar_prefetch=0,
            grid=(Mp // bm, Kp // bk),
            in_specs=[pl.BlockSpec((bm, bk), lambda i, k: (i, k)),
                      pl.BlockSpec((bk, OCp), lambda i, k: (k, 0)),
                      pl.BlockSpec((1, OCp), lambda i, k: (0, 0)),
                      pl.BlockSpec((1, OCp), lambda i, k: (0, 0)),
                      pl.BlockSpec((1, OCp), lambda i, k: (0, 0))],
            out_specs=pl.BlockSpec((bm, OCp), lambda i, k: (i, 0)),
            scratch_shapes=[pltpu.VMEM((bm, OCp), jnp.float32)]),
        compiler_params=pltpu.CompilerParams(
            dimension_semantics=("parallel", "arbitrary"),
            vmem_limit_bytes=48 * 1024 * 1024),
    )(xp, wp, bp, sp, tp)
    out = out[:M]
    return out[:, :OC] if slice_cols else out


def add_mm_relu_bn(a, c, w, b, scale, shift, *, block_m=512):
    """BN1d(ReLU((a + c) @ w + b)). a, c: (M, K); w: (K, OC)."""
    assert a.shape == c.shape
    M, K = a.shape
    OC = w.shape[1]
    Mp, Kp, OCp, bm, bk = _tiling(M, K, OC, block_m)

    ap = jnp.pad(a, ((0, Mp - M), (0, Kp - K))).astype(jnp.bfloat16)
    cp = jnp.pad(c, ((0, Mp - M), (0, Kp - K))).astype(jnp.bfloat16)
    wp = jnp.pad(w, ((0, Kp - K), (0, OCp - OC))).astype(jnp.bfloat16)
    bp, sp, tp = _pad_vec(b, OCp), _pad_vec(scale, OCp), _pad_vec(shift, OCp)

    out = pl.pallas_call(
        _add_mm_relu_bn_kernel,
        out_shape=jax.ShapeDtypeStruct((Mp, OCp), jnp.float32),
        grid_spec=pltpu.PrefetchScalarGridSpec(
            num_scalar_prefetch=0,
            grid=(Mp // bm, Kp // bk),
            in_specs=[pl.BlockSpec((bm, bk), lambda i, k: (i, k)),
                      pl.BlockSpec((bm, bk), lambda i, k: (i, k)),
                      pl.BlockSpec((bk, OCp), lambda i, k: (k, 0)),
                      pl.BlockSpec((1, OCp), lambda i, k: (0, 0)),
                      pl.BlockSpec((1, OCp), lambda i, k: (0, 0)),
                      pl.BlockSpec((1, OCp), lambda i, k: (0, 0))],
            out_specs=pl.BlockSpec((bm, OCp), lambda i, k: (i, 0)),
            scratch_shapes=[pltpu.VMEM((bm, OCp), jnp.float32)]),
        compiler_params=pltpu.CompilerParams(
            dimension_semantics=("parallel", "arbitrary"),
            vmem_limit_bytes=48 * 1024 * 1024),
    )(ap, cp, wp, bp, sp, tp)
    return out[:M, :OC]


def _maxpool_kernel(x_ref, o_ref, *, H, W, OH, OW):
    # MaxPool2d(kernel=3, stride=2, padding=1) on an NHWC block, shifted-max.
    x = x_ref[...]                                         # (bn, H, W, C)
    bn, _, _, C = x.shape
    neg = jnp.finfo(jnp.float32).min
    pr = jnp.full((bn, 1, W, C), neg, jnp.float32)
    xp = jnp.concatenate([pr, x, pr], axis=1)              # (bn, H+2, W, C)
    pc = jnp.full((bn, H + 2, 1, C), neg, jnp.float32)
    xp = jnp.concatenate([pc, xp, pc], axis=2)             # (bn, H+2, W+2, C)
    # Row-window max (stride-1), then pick even starts.
    rm = jnp.maximum(jnp.maximum(xp[:, 0:H], xp[:, 1:H + 1]), xp[:, 2:H + 2])
    rm = jnp.concatenate([rm[:, 2 * i:2 * i + 1] for i in range(OH)], axis=1)
    # Column-window max (stride-1), then pick even starts.
    cm = jnp.maximum(jnp.maximum(rm[:, :, 0:W], rm[:, :, 1:W + 1]),
                     rm[:, :, 2:W + 2])
    o_ref[...] = jnp.concatenate(
        [cm[:, :, 2 * j:2 * j + 1] for j in range(OW)], axis=2)


def maxpool_3x3_s2_p1_nhwc(x):
    """x: (N, H, W, C) -> (N, OH, OW, C) with kernel=3, stride=2, pad=1."""
    N, H, W, C = x.shape
    OH = (H - 1) // 2 + 1
    OW = (W - 1) // 2 + 1
    bn = min(8, N)
    Np = _round_up(N, bn)
    xp = jnp.pad(x, ((0, Np - N), (0, 0), (0, 0), (0, 0)))
    out = pl.pallas_call(
        functools.partial(_maxpool_kernel, H=H, W=W, OH=OH, OW=OW),
        grid=(Np // bn,),
        in_specs=[pl.BlockSpec((bn, H, W, C), lambda i: (i, 0, 0, 0))],
        out_specs=pl.BlockSpec((bn, OH, OW, C), lambda i: (i, 0, 0, 0)),
        out_shape=jax.ShapeDtypeStruct((Np, OH, OW, C), jnp.float32),
        compiler_params=pltpu.CompilerParams(
            dimension_semantics=("parallel",)),
    )(xp)
    return out[:N]


def _rect_mask_kernel(h_ref, t_ref, o_ref, *, S, blk):
    base = pl.program_id(0) * blk
    xr = lax.broadcasted_iota(jnp.int32, (S, S), 0)   # varies along dim 0 ("x")
    yr = lax.broadcasted_iota(jnp.int32, (S, S), 1)   # varies along dim 1 ("y")
    for r in range(blk):                              # static unroll over block
        idx = base + r

        def rect(ref, idx=idx):
            return ((xr >= ref[4 * idx + 0]) & (xr <= ref[4 * idx + 1]) &
                    (yr >= ref[4 * idx + 2]) & (yr <= ref[4 * idx + 3])
                    ).astype(jnp.float32)

        o_ref[r, 0] = rect(h_ref)
        o_ref[r, 1] = rect(t_ref)


def rect_masks(head_lims, tail_lims, rect_size):
    """head_lims/tail_lims: (num_rel, 4) int32 = [floor(b0), ceil(b1), floor(b2), ceil(b3)].
    Returns (num_rel, 2, S, S) float32 rectangle masks (head, tail)."""
    num_rel = head_lims.shape[0]
    S = rect_size
    blk = min(8, num_rel)
    nrp = _round_up(num_rel, blk)

    def flat(a):
        return jnp.pad(a, ((0, nrp - num_rel), (0, 0))).reshape(-1)

    out = pl.pallas_call(
        functools.partial(_rect_mask_kernel, S=S, blk=blk),
        grid=(nrp // blk,),
        in_specs=[pl.BlockSpec(memory_space=pltpu.MemorySpace.SMEM),
                  pl.BlockSpec(memory_space=pltpu.MemorySpace.SMEM)],
        out_specs=pl.BlockSpec((blk, 2, S, S), lambda i: (i, 0, 0, 0)),
        out_shape=jax.ShapeDtypeStruct((nrp, 2, S, S), jnp.float32),
    )(flat(head_lims), flat(tail_lims))
    return out[:num_rel]


# ------------------------------ JAX glue ------------------------------------

def bbox_resize(bbox, origin_h, origin_w, new_h, new_w):
    rh = new_h / origin_h
    rw = new_w / origin_w
    return jnp.stack([bbox[:, 0] * rh, bbox[:, 1] * rh,
                      bbox[:, 2] * rw, bbox[:, 3] * rw], axis=1)


def union_bbox(a, b):
    return jnp.stack([jnp.minimum(a[:, 0], b[:, 0]),
                      jnp.maximum(a[:, 1], b[:, 1]),
                      jnp.minimum(a[:, 2], b[:, 2]),
                      jnp.maximum(a[:, 3], b[:, 3])], axis=1)


def _im2col_nhwc(x, kh, kw, stride, pad):
    """NHWC -> (N*OH*OW, kh*kw*C) patch matrix; column order (kh, kw, c)."""
    N, H, W, C = x.shape
    OH = (H + 2 * pad - kh) // stride + 1
    OW = (W + 2 * pad - kw) // stride + 1
    xp = jnp.pad(x, ((0, 0), (pad, pad), (pad, pad), (0, 0)))
    cols = []
    for i in range(kh):
        for j in range(kw):
            cols.append(xp[:,
                           i:i + stride * (OH - 1) + 1:stride,
                           j:j + stride * (OW - 1) + 1:stride, :])
    arr = jnp.concatenate(cols, axis=-1)            # (N, OH, OW, kh*kw*C)
    return arr.reshape(N * OH * OW, kh * kw * C), OH, OW


def roi_align(feat, rois, out_size, spatial_scale, sampling_ratio):
    """torchvision-style RoIAlign (aligned=False). feat: (N,C,H,W);
    rois: (num_rois, 5) = (batch_idx, x1, y1, x2, y2)."""
    N, C, H, W = feat.shape
    R = out_size
    sr = sampling_ratio

    def bilinear(fm, y, x):
        valid = (y >= -1.0) & (y <= H) & (x >= -1.0) & (x <= W)
        y = jnp.maximum(y, 0.0)
        x = jnp.maximum(x, 0.0)
        y_low = jnp.minimum(jnp.floor(y).astype(jnp.int32), H - 1)
        x_low = jnp.minimum(jnp.floor(x).astype(jnp.int32), W - 1)
        y_high = jnp.minimum(y_low + 1, H - 1)
        x_high = jnp.minimum(x_low + 1, W - 1)
        y = jnp.where(y_low >= H - 1, float(H - 1), y)
        x = jnp.where(x_low >= W - 1, float(W - 1), x)
        ly = y - y_low.astype(jnp.float32)
        lx = x - x_low.astype(jnp.float32)
        hy = 1.0 - ly
        hx = 1.0 - lx
        v1 = fm[:, y_low, x_low]
        v2 = fm[:, y_low, x_high]
        v3 = fm[:, y_high, x_low]
        v4 = fm[:, y_high, x_high]
        out = hy * hx * v1 + hy * lx * v2 + ly * hx * v3 + ly * lx * v4
        return jnp.where(valid, out, 0.0)

    def one(roi):
        idx = roi[0].astype(jnp.int32)
        x1 = roi[1] * spatial_scale
        y1 = roi[2] * spatial_scale
        x2 = roi[3] * spatial_scale
        y2 = roi[4] * spatial_scale
        roi_w = jnp.maximum(x2 - x1, 1.0)
        roi_h = jnp.maximum(y2 - y1, 1.0)
        bin_h = roi_h / R
        bin_w = roi_w / R
        p = jnp.arange(R, dtype=jnp.float32)
        samp = jnp.arange(sr, dtype=jnp.float32) + 0.5
        ys = y1 + p[:, None] * bin_h + samp[None, :] * bin_h / sr   # (R, sr)
        xs = x1 + p[:, None] * bin_w + samp[None, :] * bin_w / sr   # (R, sr)
        Y = jnp.broadcast_to(ys.reshape(R, 1, sr, 1), (R, R, sr, sr))
        X = jnp.broadcast_to(xs.reshape(1, R, 1, sr), (R, R, sr, sr))
        fm = jnp.take(feat, idx, axis=0)                             # (C, H, W)
        vals = bilinear(fm, Y, X)                                    # (C, R, R, sr, sr)
        return vals.mean(axis=(-1, -2))                              # (C, R, R)

    return jax.vmap(one)(rois)


def bn_affine(bn, eps=1e-5):
    gamma, beta, mean, var = bn
    scale = gamma / jnp.sqrt(var + eps)
    shift = beta - mean * scale
    return scale, shift


def init_params(key, in_channels, resolution, representation_size):
    C = in_channels
    C2 = C // 2
    R = resolution
    ks = jax.random.split(key, 9)

    def bn(kk, n):
        k1, k2, k3, k4 = jax.random.split(kk, 4)
        gamma = 1.0 + 0.1 * jax.random.normal(k1, (n,), jnp.float32)
        beta = 0.1 * jax.random.normal(k2, (n,), jnp.float32)
        mean = 0.1 * jax.random.normal(k3, (n,), jnp.float32)
        var = 1.0 + 0.1 * jax.random.uniform(k4, (n,), jnp.float32)
        return gamma, beta, mean, var

    p = {
        "conv1_w": 0.1 * jax.random.normal(ks[0], (C2, 2, 7, 7), jnp.float32),
        "conv1_b": 0.1 * jax.random.normal(ks[1], (C2,), jnp.float32),
        "bn1": bn(ks[2], C2),
        "conv2_w": 0.1 * jax.random.normal(ks[3], (C, C2, 3, 3), jnp.float32),
        "conv2_b": 0.1 * jax.random.normal(ks[4], (C,), jnp.float32),
        "bn2": bn(ks[5], C),
        # fc_w columns in PyTorch (c, h, w) flatten order.
        "fc_w": 0.1 * jax.random.normal(ks[6], (representation_size, C * R * R), jnp.float32),
        "fc_b": 0.1 * jax.random.normal(ks[7], (representation_size,), jnp.float32),
        "bn_fc": bn(ks[8], representation_size),
    }
    return p


def union_box_feature_extractor(params, images, feature, bbox_s, bbox_o, *,
                                in_channels, resolution, scale, sampling_ratio,
                                representation_size):
    C = in_channels
    C2 = C // 2
    R = resolution
    S = R * 4 - 1                        # rect_size
    N = feature.shape[0]
    num_rel = bbox_s.shape[0]
    img_h, img_w = images.shape[2], images.shape[3]
    if num_rel != N:
        raise ValueError("num relations must equal feature batch "
                         "(forward_pool uses arange(batch) as roi indices)")

    # --- union boxes ---
    ub = union_bbox(bbox_s, bbox_o)

    # --- rect inputs (Pallas batched mask kernel) ---
    hb = bbox_resize(bbox_s, img_h, img_w, S, S)
    tb = bbox_resize(bbox_o, img_h, img_w, S, S)

    def lims(b):
        return jnp.stack([jnp.floor(b[:, 0]), jnp.ceil(b[:, 1]),
                          jnp.floor(b[:, 2]), jnp.ceil(b[:, 3])],
                         axis=1).astype(jnp.int32)

    rect_inputs = rect_masks(lims(hb), lims(tb), S)          # (num_rel, 2, S, S)
    rect_nhwc = jnp.transpose(rect_inputs, (0, 2, 3, 1))     # (num_rel, S, S, 2), tiny

    # --- rect_conv: conv7x7/s2 + ReLU + BN, maxpool3x3/s2, conv3x3 + ReLU + BN ---
    s1, t1 = bn_affine(params["bn1"])
    x1, oh1, ow1 = _im2col_nhwc(rect_nhwc, 7, 7, 2, 3)        # (num_rel*oh1*ow1, 98)
    w1 = params["conv1_w"].transpose(2, 3, 1, 0).reshape(7 * 7 * 2, C2)
    # keep 128-padded channels (pad cols compute to exactly 0) so the pool is lane-dense
    y1 = mm_relu_bn(x1, w1, params["conv1_b"], s1, t1, slice_cols=False)
    ocp1 = y1.shape[1]
    y1 = y1.reshape(num_rel, oh1, ow1, ocp1)                  # NHWC, lane-dense

    y1p = maxpool_3x3_s2_p1_nhwc(y1)[:, :, :, :C2]            # (num_rel, R, R, C2)

    s2, t2 = bn_affine(params["bn2"])
    x2, oh2, ow2 = _im2col_nhwc(y1p, 3, 3, 1, 1)              # (num_rel*R*R, 9*C2)
    w2 = params["conv2_w"].transpose(2, 3, 1, 0).reshape(9 * C2, C)
    y2 = mm_relu_bn(x2, w2, params["conv2_b"], s2, t2)        # (num_rel*R*R, C)
    rect_features = y2.reshape(num_rel, oh2, ow2, C)          # NHWC

    # --- RoIAlign on union boxes (matches forward_pool's bbox[:, [0,2,1,3]] packing) ---
    rois = jnp.concatenate(
        [jnp.arange(N, dtype=jnp.float32)[:, None],
         ub[:, 0:1], ub[:, 2:3], ub[:, 1:2], ub[:, 3:4]], axis=1)
    union_vis = roi_align(feature, rois, R, scale, sampling_ratio)   # (N, C, R, R)

    # --- fused add + Linear + ReLU + BN1d (Pallas) ---
    # Flatten in (h, w, c) order and permute fc weight columns to match the
    # PyTorch (c, h, w) flatten — mathematically identical.
    sfc, tfc = bn_affine(params["bn_fc"])
    a = jnp.transpose(union_vis, (0, 2, 3, 1)).reshape(N, R * R * C)
    c = rect_features.reshape(num_rel, R * R * C)
    fc_w_hwc = params["fc_w"].reshape(representation_size, C, R, R)
    fc_w_hwc = fc_w_hwc.transpose(0, 2, 3, 1).reshape(representation_size, R * R * C)
    out = add_mm_relu_bn(a, c, fc_w_hwc.T, params["fc_b"], sfc, tfc)
    return out                                               # (N, representation_size)


# --------------------------------- main -------------------------------------

if __name__ == "__main__":
    key = jax.random.PRNGKey(0)
    in_channels = 8
    resolution = 4
    spatial_scale = 1.0
    sampling_ratio = 2
    representation_size = 32
    N = 2  # num relations == feature batch (required by forward_pool's arange)

    k_img, k_feat, kb1, kb2, kb3, kb4, k_p = jax.random.split(key, 7)
    images = jax.random.normal(k_img, (N, 3, 16, 16), jnp.float32)
    feature = jax.random.normal(k_feat, (N, in_channels, 16, 16), jnp.float32)

    def make_bbox(k1, k2):
        lo_h = jax.random.uniform(k1, (N,), jnp.float32, 0.0, 9.0)
        lo_w = jax.random.uniform(k2, (N,), jnp.float32, 0.0, 9.0)
        hi_h = lo_h + 2.0 + jax.random.uniform(k1, (N,), jnp.float32, 0.0, 5.0)
        hi_w = lo_w + 2.0 + jax.random.uniform(k2, (N,), jnp.float32, 0.0, 5.0)
        return jnp.stack([lo_h, hi_h, lo_w, hi_w], axis=1)

    bbox_s = make_bbox(kb1, kb2)
    bbox_o = make_bbox(kb3, kb4)

    params = init_params(k_p, in_channels, resolution, representation_size)

    out = union_box_feature_extractor(
        params, images, feature, bbox_s, bbox_o,
        in_channels=in_channels, resolution=resolution, scale=spatial_scale,
        sampling_ratio=sampling_ratio, representation_size=representation_size)
    out = jax.block_until_ready(out)
    assert out.shape == (N, representation_size) and out.dtype == jnp.float32
    print("KERNEL_OK")
</pallas_src>

<mosaic_0001>
module attributes {stable_mosaic.version = 11 : i64} {
  func.func @_rect_mask_kernel(%arg0: i32, %arg1: memref<8xi32, #tpu.memory_space<smem>>, %arg2: memref<8xi32, #tpu.memory_space<smem>>, %arg3: memref<2x2x15x15xf32, #tpu.memory_space<vmem>>) attributes {dimension_semantics = [#tpu.dimension_semantics<arbitrary>], iteration_bounds = array<i64: 1>, scalar_prefetch = 0 : i64, scratch_operands = 0 : i64, tpu.core_type = #tpu.core_type<tc>, window_params = [{transform_indices = @transform_0, window_bounds = array<i64: 8>}, {transform_indices = @transform_1, window_bounds = array<i64: 8>}, {transform_indices = @transform_2, window_bounds = array<i64: 2, 2, 15, 15>}]} {
    %c2_i32 = arith.constant 2 : i32
    %0 = arith.muli %arg0, %c2_i32 : i32
    %1 = tpu.iota {dimensions = array<i32: 0>} : vector<15x15xi32>
    %2 = tpu.iota {dimensions = array<i32: 1>} : vector<15x15xi32>
    %c0_i32 = arith.constant 0 : i32
    %3 = arith.addi %0, %c0_i32 : i32
    %c4_i32 = arith.constant 4 : i32
    %4 = arith.muli %c4_i32, %3 : i32
    %c0_i32_0 = arith.constant 0 : i32
    %5 = arith.addi %4, %c0_i32_0 : i32
    %6 = arith.index_cast %5 : i32 to index
    %7 = memref.load %arg1[%6] : memref<8xi32, #tpu.memory_space<smem>>
    %8 = vector.broadcast %7 : i32 to vector<15x15xi32>
    %9 = arith.cmpi sge, %1, %8 : vector<15x15xi32>
    %c4_i32_1 = arith.constant 4 : i32
    %10 = arith.muli %c4_i32_1, %3 : i32
    %c1_i32 = arith.constant 1 : i32
    %11 = arith.addi %10, %c1_i32 : i32
    %12 = arith.index_cast %11 : i32 to index
    %13 = memref.load %arg1[%12] : memref<8xi32, #tpu.memory_space<smem>>
    %14 = vector.broadcast %13 : i32 to vector<15x15xi32>
    %15 = arith.cmpi sle, %1, %14 : vector<15x15xi32>
    %16 = arith.andi %9, %15 : vector<15x15xi1>
    %c4_i32_2 = arith.constant 4 : i32
    %17 = arith.muli %c4_i32_2, %3 : i32
    %c2_i32_3 = arith.constant 2 : i32
    %18 = arith.addi %17, %c2_i32_3 : i32
    %19 = arith.index_cast %18 : i32 to index
    %20 = memref.load %arg1[%19] : memref<8xi32, #tpu.memory_space<smem>>
    %21 = vector.broadcast %20 : i32 to vector<15x15xi32>
    %22 = arith.cmpi sge, %2, %21 : vector<15x15xi32>
    %23 = arith.andi %16, %22 : vector<15x15xi1>
    %c4_i32_4 = arith.constant 4 : i32
    %24 = arith.muli %c4_i32_4, %3 : i32
    %c3_i32 = arith.constant 3 : i32
    %25 = arith.addi %24, %c3_i32 : i32
    %26 = arith.index_cast %25 : i32 to index
    %27 = memref.load %arg1[%26] : memref<8xi32, #tpu.memory_space<smem>>
    %28 = vector.broadcast %27 : i32 to vector<15x15xi32>
    %29 = arith.cmpi sle, %2, %28 : vector<15x15xi32>
    %30 = arith.andi %23, %29 : vector<15x15xi1>
    %31 = arith.extui %30 : vector<15x15xi1> to vector<15x15xi32>
    %32 = arith.sitofp %31 : vector<15x15xi32> to vector<15x15xf32>
    %c0 = arith.constant 0 : index
    %c0_5 = arith.constant 0 : index
    %c0_6 = arith.constant 0 : index
    %c0_7 = arith.constant 0 : index
    %33 = vector.load %arg3[%c0, %c0_5, %c0_6, %c0_7] : memref<2x2x15x15xf32, #tpu.memory_space<vmem>>, vector<1x1x15x15xf32>
    %34 = vector.shape_cast %33 : vector<1x1x15x15xf32> to vector<15x15xf32>
    %35 = vector.shape_cast %32 : vector<15x15xf32> to vector<1x1x15x15xf32>
    tpu.vector_store %arg3[%c0, %c0_5, %c0_6, %c0_7], %35 {strides = array<i32>} : memref<2x2x15x15xf32, #tpu.memory_space<vmem>>, vector<1x1x15x15xf32>,
    %c4_i32_8 = arith.constant 4 : i32
    %36 = arith.muli %c4_i32_8, %3 : i32
    %c0_i32_9 = arith.constant 0 : i32
    %37 = arith.addi %36, %c0_i32_9 : i32
    %38 = arith.index_cast %37 : i32 to index
    %39 = memref.load %arg2[%38] : memref<8xi32, #tpu.memory_space<smem>>
    %40 = vector.broadcast %39 : i32 to vector<15x15xi32>
    %41 = arith.cmpi sge, %1, %40 : vector<15x15xi32>
    %c4_i32_10 = arith.constant 4 : i32
    %42 = arith.muli %c4_i32_10, %3 : i32
    %c1_i32_11 = arith.constant 1 : i32
    %43 = arith.addi %42, %c1_i32_11 : i32
    %44 = arith.index_cast %43 : i32 to index
    %45 = memref.load %arg2[%44] : memref<8xi32, #tpu.memory_space<smem>>
    %46 = vector.broadcast %45 : i32 to vector<15x15xi32>
    %47 = arith.cmpi sle, %1, %46 : vector<15x15xi32>
    %48 = arith.andi %41, %47 : vector<15x15xi1>
    %c4_i32_12 = arith.constant 4 : i32
    %49 = arith.muli %c4_i32_12, %3 : i32
    %c2_i32_13 = arith.constant 2 : i32
    %50 = arith.addi %49, %c2_i32_13 : i32
    %51 = arith.index_cast %50 : i32 to index
    %52 = memref.load %arg2[%51] : memref<8xi32, #tpu.memory_space<smem>>
    %53 = vector.broadcast %52 : i32 to vector<15x15xi32>
    %54 = arith.cmpi sge, %2, %53 : vector<15x15xi32>
    %55 = arith.andi %48, %54 : vector<15x15xi1>
    %c4_i32_14 = arith.constant 4 : i32
    %56 = arith.muli %c4_i32_14, %3 : i32
    %c3_i32_15 = arith.constant 3 : i32
    %57 = arith.addi %56, %c3_i32_15 : i32
    %58 = arith.index_cast %57 : i32 to index
    %59 = memref.load %arg2[%58] : memref<8xi32, #tpu.memory_space<smem>>
    %60 = vector.broadcast %59 : i32 to vector<15x15xi32>
    %61 = arith.cmpi sle, %2, %60 : vector<15x15xi32>
    %62 = arith.andi %55, %61 : vector<15x15xi1>
    %63 = arith.extui %62 : vector<15x15xi1> to vector<15x15xi32>
    %64 = arith.sitofp %63 : vector<15x15xi32> to vector<15x15xf32>
    %c0_16 = arith.constant 0 : index
    %c1 = arith.constant 1 : index
    %c0_17 = arith.constant 0 : index
    %c0_18 = arith.constant 0 : index
    %65 = vector.load %arg3[%c0_16, %c1, %c0_17, %c0_18] : memref<2x2x15x15xf32, #tpu.memory_space<vmem>>, vector<1x1x15x15xf32>
    %66 = vector.shape_cast %65 : vector<1x1x15x15xf32> to vector<15x15xf32>
    %67 = vector.shape_cast %64 : vector<15x15xf32> to vector<1x1x15x15xf32>
    tpu.vector_store %arg3[%c0_16, %c1, %c0_17, %c0_18], %67 {strides = array<i32>} : memref<2x2x15x15xf32, #tpu.memory_space<vmem>>, vector<1x1x15x15xf32>,
    %c1_i32_19 = arith.constant 1 : i32
    %68 = arith.addi %0, %c1_i32_19 : i32
    %c4_i32_20 = arith.constant 4 : i32
    %69 = arith.muli %c4_i32_20, %68 : i32
    %c0_i32_21 = arith.constant 0 : i32
    %70 = arith.addi %69, %c0_i32_21 : i32
    %71 = arith.index_cast %70 : i32 to index
    %72 = memref.load %arg1[%71] : memref<8xi32, #tpu.memory_space<smem>>
    %73 = vector.broadcast %72 : i32 to vector<15x15xi32>
    %74 = arith.cmpi sge, %1, %73 : vector<15x15xi32>
    %c4_i32_22 = arith.constant 4 : i32
    %75 = arith.muli %c4_i32_22, %68 : i32
    %c1_i32_23 = arith.constant 1 : i32
    %76 = arith.addi %75, %c1_i32_23 : i32
    %77 = arith.index_cast %76 : i32 to index
    %78 = memref.load %arg1[%77] : memref<8xi32, #tpu.memory_space<smem>>
    %79 = vector.broadcast %78 : i32 to vector<15x15xi32>
    %80 = arith.cmpi sle, %1, %79 : vector<15x15xi32>
    %81 = arith.andi %74, %80 : vector<15x15xi1>
    %c4_i32_24 = arith.constant 4 : i32
    %82 = arith.muli %c4_i32_24, %68 : i32
    %c2_i32_25 = arith.constant 2 : i32
    %83 = arith.addi %82, %c2_i32_25 : i32
    %84 = arith.index_cast %83 : i32 to index
    %85 = memref.load %arg1[%84] : memref<8xi32, #tpu.memory_space<smem>>
    %86 = vector.broadcast %85 : i32 to vector<15x15xi32>
    %87 = arith.cmpi sge, %2, %86 : vector<15x15xi32>
    %88 = arith.andi %81, %87 : vector<15x15xi1>
    %c4_i32_26 = arith.constant 4 : i32
    %89 = arith.muli %c4_i32_26, %68 : i32
    %c3_i32_27 = arith.constant 3 : i32
    %90 = arith.addi %89, %c3_i32_27 : i32
    %91 = arith.index_cast %90 : i32 to index
    %92 = memref.load %arg1[%91] : memref<8xi32, #tpu.memory_space<smem>>
    %93 = vector.broadcast %92 : i32 to vector<15x15xi32>
    %94 = arith.cmpi sle, %2, %93 : vector<15x15xi32>
    %95 = arith.andi %88, %94 : vector<15x15xi1>
    %96 = arith.extui %95 : vector<15x15xi1> to vector<15x15xi32>
    %97 = arith.sitofp %96 : vector<15x15xi32> to vector<15x15xf32>
    %c1_28 = arith.constant 1 : index
    %c0_29 = arith.constant 0 : index
    %c0_30 = arith.constant 0 : index
    %c0_31 = arith.constant 0 : index
    %98 = vector.load %arg3[%c1_28, %c0_29, %c0_30, %c0_31] : memref<2x2x15x15xf32, #tpu.memory_space<vmem>>, vector<1x1x15x15xf32>
    %99 = vector.shape_cast %98 : vector<1x1x15x15xf32> to vector<15x15xf32>
    %100 = vector.shape_cast %97 : vector<15x15xf32> to vector<1x1x15x15xf32>
    tpu.vector_store %arg3[%c1_28, %c0_29, %c0_30, %c0_31], %100 {strides = array<i32>} : memref<2x2x15x15xf32, #tpu.memory_space<vmem>>, vector<1x1x15x15xf32>,
    %c4_i32_32 = arith.constant 4 : i32
    %101 = arith.muli %c4_i32_32, %68 : i32
    %c0_i32_33 = arith.constant 0 : i32
    %102 = arith.addi %101, %c0_i32_33 : i32
    %103 = arith.index_cast %102 : i32 to index
    %104 = memref.load %arg2[%103] : memref<8xi32, #tpu.memory_space<smem>>
    %105 = vector.broadcast %104 : i32 to vector<15x15xi32>
    %106 = arith.cmpi sge, %1, %105 : vector<15x15xi32>
    %c4_i32_34 = arith.constant 4 : i32
    %107 = arith.muli %c4_i32_34, %68 : i32
    %c1_i32_35 = arith.constant 1 : i32
    %108 = arith.addi %107, %c1_i32_35 : i32
    %109 = arith.index_cast %108 : i32 to index
    %110 = memref.load %arg2[%109] : memref<8xi32, #tpu.memory_space<smem>>
    %111 = vector.broadcast %110 : i32 to vector<15x15xi32>
    %112 = arith.cmpi sle, %1, %111 : vector<15x15xi32>
    %113 = arith.andi %106, %112 : vector<15x15xi1>
    %c4_i32_36 = arith.constant 4 : i32
    %114 = arith.muli %c4_i32_36, %68 : i32
    %c2_i32_37 = arith.constant 2 : i32
    %115 = arith.addi %114, %c2_i32_37 : i32
    %116 = arith.index_cast %115 : i32 to index
    %117 = memref.load %arg2[%116] : memref<8xi32, #tpu.memory_space<smem>>
    %118 = vector.broadcast %117 : i32 to vector<15x15xi32>
    %119 = arith.cmpi sge, %2, %118 : vector<15x15xi32>
    %120 = arith.andi %113, %119 : vector<15x15xi1>
    %c4_i32_38 = arith.constant 4 : i32
    %121 = arith.muli %c4_i32_38, %68 : i32
    %c3_i32_39 = arith.constant 3 : i32
    %122 = arith.addi %121, %c3_i32_39 : i32
    %123 = arith.index_cast %122 : i32 to index
    %124 = memref.load %arg2[%123] : memref<8xi32, #tpu.memory_space<smem>>
    %125 = vector.broadcast %124 : i32 to vector<15x15xi32>
    %126 = arith.cmpi sle, %2, %125 : vector<15x15xi32>
    %127 = arith.andi %120, %126 : vector<15x15xi1>
    %128 = arith.extui %127 : vector<15x15xi1> to vector<15x15xi32>
    %129 = arith.sitofp %128 : vector<15x15xi32> to vector<15x15xf32>
    %c1_40 = arith.constant 1 : index
    %c1_41 = arith.constant 1 : index
    %c0_42 = arith.constant 0 : index
    %c0_43 = arith.constant 0 : index
    %130 = vector.load %arg3[%c1_40, %c1_41, %c0_42, %c0_43] : memref<2x2x15x15xf32, #tpu.memory_space<vmem>>, vector<1x1x15x15xf32>
    %131 = vector.shape_cast %130 : vector<1x1x15x15xf32> to vector<15x15xf32>
    %132 = vector.shape_cast %129 : vector<15x15xf32> to vector<1x1x15x15xf32>
    tpu.vector_store %arg3[%c1_40, %c1_41, %c0_42, %c0_43], %132 {strides = array<i32>} : memref<2x2x15x15xf32, #tpu.memory_space<vmem>>, vector<1x1x15x15xf32>,
    return
  }
  func.func @transform_0(%arg0: i32) -> i32 {
    %c0_i32 = arith.constant 0 : i32
    %c0_i32_0 = arith.constant 0 : i32
    return %c0_i32 : i32
  }
  func.func @transform_1(%arg0: i32) -> i32 {
    %c0_i32 = arith.constant 0 : i32
    %c0_i32_0 = arith.constant 0 : i32
    return %c0_i32 : i32
  }
  func.func @transform_2(%arg0: i32) -> (i32, i32, i32, i32) {
    %c0_i32 = arith.constant 0 : i32
    %c0_i32_0 = arith.constant 0 : i32
    %c0_i32_1 = arith.constant 0 : i32
    %c0_i32_2 = arith.constant 0 : i32
    return %arg0, %c0_i32, %c0_i32_0, %c0_i32_1 : i32, i32, i32, i32
  }
}

</mosaic_0001>

<bundles_post_ra>
// kernel: tpu_custom_call.1
= control target key start
LH: loop header
LB: loop body
LE: loop exit
PB: predicated region body
PF: predicated region fallthrough
CT: control target
= control target key end

     0   :  { %7 = vsyncpa [#allocation3], 0  ;;  %s452_s0 = inlined_call_operand.hbm [shape: s32[8], index: 0, kind: input, shape index: {}]   ;;  %s453_s1 = inlined_call_operand.hbm [shape: s32[8], index: 1, kind: input, shape index: {}]   ;;  %s454_s2 = inlined_call_operand.vmem [shape: f32[2,2,15,15], index: 2, kind: output, shape index: {}]  }
   0x1   :  { %s14_s11 = sshll.u32 %s452_s0, 4  ;;  %s15_s11 = int_to_ptr.hbm [resolvable:$true] %s14_s11 }
   0x2   :  { %8 = vsyncpa [#allocation5], 0  ;;  %s23_s14 = sshll.u32 %s453_s1, 4  ;;  %s225_s15 = smov [#allocation2]   ;;  %s24_s14 = int_to_ptr.hbm [resolvable:$true] %s23_s14 }
   0x3   :  { %17 = dma.hbm_to_smem %s15_s11, 16, %s225_s15, [#allocation3]  }
   0x4   :  { %s226_s16 = smov [#allocation4]  }
   0x5   :  { %26 = dma.hbm_to_smem %s24_s14, 16, %s226_s16, [#allocation5]  }
   0x6   :  { %221 = dma.done.wait [#allocation3], 16  }
   0x7   :  { %222 = vsyncadd [#allocation3], 4294967280 }
   0x8   :  { %223 = dma.done.wait [#allocation5], 16  }
   0x9   :  { %224 = vsyncadd [#allocation5], 4294967280 }
   0xa   :  { %35 = sfence }
   0xb   :  { %v37_v0 = vlaneseq  ;;  %s43_s17 = sld [smem:[#allocation2]]  ;;  %vm70_vm8 = vcmask 121856   ;;  %v227_v14 = vmov 0.0   ;;  %vm72_vm14 = vcmask 120832  }
   0xc   :  { %s166_s18 = sld [smem:[#allocation2 + $0x1]] }
   0xd   :  { %v249_v1 = vshrl.u32 %v37_v0, 7  ;;  %s167_s0 = sld [smem:[#allocation2 + $0x2]]  ;;  %v253_v2 = vand.u32 127, %v37_v0 }
   0xe   :  { %s168_s19 = sld [smem:[#allocation2 + $0x3]] }
   0xf   :  { %s251_s20 = sld [smem:[#allocation4]]  ;;  %v256_v3 = vadd.s32 8, %v249_v1 }
  0x10   :  { %s258_s1 = sld [smem:[#allocation4 + $0x1]] }
  0x11   :  { %v44_v4 = vstv %s43_s17  ;;  %s260_s21 = sld [smem:[#allocation4 + $0x2]] }
  0x12   :  { %vm45_vm0 = vcmp.ge.s32.totalorder %v249_v1, %v44_v4  ;;  %v49_v5 = vstv %s166_s18  ;;  %s263_s22 = sld [smem:[#allocation4 + $0x3]]  ;;  %vm274_vm4 = vcmp.ge.s32.totalorder %v256_v3, %v44_v4 }
  0x13   :  { %vm50_vm1 = vcmp.le.s32.totalorder %v249_v1, %v49_v5  ;;  %v56_v6 = vstv %s167_s0  ;;  %s266_s23 = sld [smem:[#allocation2 + $0x4]]  ;;  %vm279_vm5 = vcmp.le.s32.totalorder %v256_v3, %v49_v5 }
  0x14   :  { %vm52_vm2 = vmand %vm45_vm0, %vm50_vm1  ;;  %vm269_vm3 = vcmp.ge.s32.totalorder %v253_v2, %v56_v6  ;;  %v62_v8 = vstv %s168_s19  ;;  %s283_s24 = sld [smem:[#allocation2 + $0x5]] }
  0x15   :  { %vm58_vm6 = vmand %vm52_vm2, %vm269_vm3  ;;  %vm288_vm7 = vcmp.le.s32.totalorder %v253_v2, %v62_v8  ;;  %v75_v12 = vstv %s251_s20  ;;  %s293_s25 = sld [smem:[#allocation2 + $0x6]] }
  0x16   :  { %vm64_vm9 = vmand %vm58_vm6, %vm288_vm7  ;;  %v79_v13 = vstv %s258_s1  ;;  %s298_s26 = sld [smem:[#allocation2 + $0x7]]  ;;  %vm306_vm11 = vcmp.ge.s32.totalorder %v249_v1, %v75_v12  ;;  %vm340_vm2 = vcmp.ge.s32.totalorder %v256_v3, %v75_v12 }
  0x17   :  { %v169_v15 = vsel %vm64_vm9, 1.0, %v227_v14  ;;  %vm53_vm10 = vmand %vm274_vm4, %vm279_vm5  ;;  %vm311_vm12 = vcmp.le.s32.totalorder %v249_v1, %v79_v13  ;;  %v85_v18 = vstv %s260_s21  ;;  %s316_s27 = sld [smem:[#allocation4 + $0x4]]  ;;  %vm352_vm4 = vcmp.le.s32.totalorder %v256_v3, %v79_v13 }
  0x18   :  { %71 = vst.msk [vmem:[%s454_s2] sm:$0xff] %vm70_vm8, %v169_v15  ;;  %vm59_vm13 = vmand %vm53_vm10, %vm269_vm3  ;;  %vm325_vm15 = vcmp.ge.s32.totalorder %v253_v2, %v85_v18  ;;  %v90_v20 = vstv %s263_s22  ;;  %s330_s30 = sld [smem:[#allocation4 + $0x5]] }
  0x19   :  { %vm65_vm0 = vmand %vm59_vm13, %vm288_vm7  ;;  %vm335_vm1 = vcmp.le.s32.totalorder %v253_v2, %v90_v20  ;;  %s344_s3 = sld [smem:[#allocation4 + $0x6]]  ;;  %v104_v25 = vstv %s266_s23 }
  0x1a   :  { %v170_v23 = vsel %vm65_vm0, 1.0, %v227_v14  ;;  %vm82_vm3 = vmand %vm306_vm11, %vm311_vm12  ;;  %v109_v26 = vstv %s283_s24  ;;  %s358_s4 = sld [smem:[#allocation4 + $0x7]]  ;;  %vm376_vm9 = vcmp.ge.s32.totalorder %v249_v1, %v104_v25 }
  0x1b   :  { %73 = vst.msk [vmem:[%s454_s2 + $0x8] sm:$0x7f] %vm72_vm14, %v170_v23  ;;  %vm87_vm5 = vmand %vm82_vm3, %vm325_vm15  ;;  %v116_v27 = vstv %s293_s25  ;;  %vm110_vm10 = vcmp.le.s32.totalorder %v249_v1, %v109_v26  ;;  %vm111_vm3 = vcmp.le.s32.totalorder %v256_v3, %v109_v26 }
  0x1c   :  { %vm92_vm6 = vmand %vm87_vm5, %vm335_vm1  ;;  %v122_v28 = vstv %s298_s26  ;;  %vm388_vm12 = vcmp.ge.s32.totalorder %v253_v2, %v116_v27 }
  0x1d   :  { %v174_v29 = vsel %vm92_vm6, 1.0, %v227_v14  ;;  %vm83_vm7 = vmand %vm340_vm2, %vm352_vm4  ;;  %vm395_vm0 = vcmp.le.s32.totalorder %v253_v2, %v122_v28  ;;  %vm400_vm2 = vcmp.ge.s32.totalorder %v256_v3, %v104_v25  ;;  %v134_v35 = vstv %s316_s27 }
  0x1e   :  { %176 = vst.msk [vmem:[%s454_s2 + $0x10] sm:$0xff] %vm70_vm8, %v174_v29  ;;  %vm88_vm11 = vmand %vm83_vm7, %vm325_vm15  ;;  %v138_v36 = vstv %s330_s30  ;;  %vm135_vm6 = vcmp.ge.s32.totalorder %v249_v1, %v134_v35 }
  0x1f   :  { %vm93_vm13 = vmand %vm88_vm11, %vm335_vm1  ;;  %v144_v37 = vstv %s344_s3  ;;  %vm139_vm7 = vcmp.le.s32.totalorder %v249_v1, %v138_v36 }
  0x20   :  { %v175_v34 = vsel %vm93_vm13, 1.0, %v227_v14  ;;  %vm112_vm15 = vmand %vm376_vm9, %vm110_vm10  ;;  %v149_v38 = vstv %s358_s4  ;;  %vm145_vm10 = vcmp.ge.s32.totalorder %v253_v2, %v144_v37 }
  0x21   :  { %177 = vst.msk [vmem:[%s454_s2 + $0x18] sm:$0x7f] %vm72_vm14, %v175_v34  ;;  %vm118_vm1 = vmand %vm112_vm15, %vm388_vm12  ;;  %vm150_vm13 = vcmp.le.s32.totalorder %v253_v2, %v149_v38  ;;  %vm136_vm15 = vcmp.ge.s32.totalorder %v256_v3, %v134_v35 }
  0x22   :  { %vm124_vm4 = vmand %vm118_vm1, %vm395_vm0 }
  0x23   :  { %v182_v39 = vsel %vm124_vm4, 1.0, %v227_v14  ;;  %vm113_vm5 = vmand %vm400_vm2, %vm111_vm3  ;;  %vm140_vm3 = vcmp.le.s32.totalorder %v256_v3, %v138_v36 }
  0x24   :  { %184 = vst.msk [vmem:[%s454_s2 + $0x20] sm:$0xff] %vm70_vm8, %v182_v39  ;;  %vm119_vm9 = vmand %vm113_vm5, %vm388_vm12 }
  0x25   :  { %vm125_vm11 = vmand %vm119_vm9, %vm395_vm0 }
  0x26   :  { %v183_v40 = vsel %vm125_vm11, 1.0, %v227_v14  ;;  %vm141_vm2 = vmand %vm135_vm6, %vm139_vm7 }
  0x27   :  { %185 = vst.msk [vmem:[%s454_s2 + $0x28] sm:$0x7f] %vm72_vm14, %v183_v40  ;;  %vm146_vm12 = vmand %vm141_vm2, %vm145_vm10 }
  0x28   :  { %vm151_vm1 = vmand %vm146_vm12, %vm150_vm13 }
  0x29   :  { %v190_v41 = vsel %vm151_vm1, 1.0, %v227_v14  ;;  %vm142_vm4 = vmand %vm136_vm15, %vm140_vm3 }
  0x2a   :  { %192 = vst.msk [vmem:[%s454_s2 + $0x30] sm:$0xff] %vm70_vm8, %v190_v41  ;;  %vm147_vm0 = vmand %vm142_vm4, %vm145_vm10 }
  0x2b   :  { %vm152_vm5 = vmand %vm147_vm0, %vm150_vm13 }
  0x2c   :  { %v191_v42 = vsel %vm152_vm5, 1.0, %v227_v14 }
  0x2d   :  { %193 = vst.msk [vmem:[%s454_s2 + $0x38] sm:$0x7f] %vm72_vm14, %v191_v42 }
  0x2e   :  { %164 = vsyncpa [#allocation3], 1 }
  0x2f   :  { %165 = vsyncpa [#allocation5], 1 }

</bundles_post_ra>
